<compile_context>
chip_gen: v6e
topology: v6e:2x2x1
jax: 0.10.0
libtpu: 0.0.40
codegen_flags: <defaults>
</compile_context>

<pallas_src>
import functools

import numpy as np
import jax
import jax.numpy as jnp
from jax import lax
from jax.experimental import pallas as pl
from jax.experimental.pallas import tpu as pltpu

_EPS = 1e-5
# 3x3 tap offsets, row-major (dy, dx); index k = (dy+1)*3 + (dx+1) matches a
# (3, 3, cin, cout) HWIO kernel flattened to (9, cin, cout).
_TAPS = tuple((dy, dx) for dy in (-1, 0, 1) for dx in (-1, 0, 1))


# ----------------------------- shared math helpers -----------------------------
def _mish_ref(x):
    # torch-style mish: x * tanh(softplus(x)), softplus thresholded at 20.
    sp = jnp.where(x > 20.0, x, jnp.log1p(jnp.exp(jnp.minimum(x, 20.0))))
    return x * jnp.tanh(sp)


def _mish_kernel(x):
    # Same function, EUP-friendly: tanh(softplus(x)) = ((1+e)^2 - 1) / ((1+e)^2 + 1).
    e = jnp.exp(jnp.minimum(x, 20.0))
    a2 = (1.0 + e) * (1.0 + e)
    t = (a2 - 1.0) * pl.reciprocal(a2 + 1.0, approx=True)
    return x * jnp.where(x > 20.0, 1.0, t)


def _bn_train(h, gamma, beta, axes):
    mean = jnp.mean(h, axis=axes, keepdims=True)
    var = jnp.mean(jnp.square(h - mean), axis=axes, keepdims=True)
    return (h - mean) * lax.rsqrt(var + _EPS) * gamma + beta


# ----------------------------- Pallas kernel -----------------------------
@functools.lru_cache(maxsize=None)
def _roll_sign():
    """+1 if pltpu.roll follows jnp.roll's direction, else -1 (probed once, defensively)."""
    def k(x_ref, o_ref):
        o_ref[...] = pltpu.roll(x_ref[...], 1, axis=1)

    x = jnp.arange(8 * 128, dtype=jnp.float32).reshape(8, 128)
    rolled = pl.pallas_call(k, out_shape=jax.ShapeDtypeStruct((8, 128), jnp.float32))(x)
    return 1 if bool(jnp.array_equal(rolled, jnp.roll(x, 1, axis=1))) else -1


def _make_kernel(ow, bp, roll_sign):
    """Kernel over the (channels, batch*OH*OW) channels-on-sublanes layout."""
    shifts = [dy * ow + dx for dy, dx in _TAPS]

    def kernel(up_ref, masks_ref, w1_ref, w2_ref, ws_ref,
               g1_ref, b1_ref, g2_ref, b2_ref, gs_ref, bs_ref,
               noise_ref, strength_ref, out_ref):

        def taps(z):
            # Stack the 9 shifted + border-masked copies along sublanes -> (9*Cin, BP).
            pieces = []
            for k, s in enumerate(shifts):
                if s == 0:
                    pieces.append(z)                       # center tap: no shift, all-ones mask
                else:
                    shifted = pltpu.roll(z, (roll_sign * -s) % bp, axis=1)
                    pieces.append(shifted * masks_ref[k])  # zero the SAME-padding positions
            return jnp.concatenate(pieces, axis=0).astype(jnp.bfloat16)

        def conv(z_taps, w_ref):
            # (Cout, 9*Cin) @ (9*Cin, BP), bf16 operands, f32 accumulate on the MXU.
            return jnp.dot(w_ref[...], z_taps, preferred_element_type=jnp.float32)

        up = up_ref[...]                                   # (C1, BP) f32

        zt_up = taps(up)                                   # shared by conv1 and shortcut conv
        h1 = conv(zt_up, w1_ref)                           # (C1, BP)
        hs = conv(zt_up, ws_ref)                           # (C2, BP)

        a1 = _mish_kernel(_bn_train(h1, g1_ref[...], b1_ref[...], axes=1))
        h2 = conv(taps(a1), w2_ref)                        # (C2, BP)
        xm = _mish_kernel(_bn_train(h2, g2_ref[...], b2_ref[...], axes=1))

        xm = xm + noise_ref[...] * strength_ref[0, 0]      # noise injection (broadcast over C)
        xs = _bn_train(hs, gs_ref[...], bs_ref[...], axes=1)  # shortcut: BN, no activation

        out_ref[...] = xm + xs

    return kernel


# ----------------------------- glue / parameter setup -----------------------------
def _upsample_matrix(n_in, n_out):
    """(n_out, n_in) 1-D bilinear interpolation matrix, align_corners=True."""
    i = np.arange(n_out, dtype=np.float64)
    src = i * (n_in - 1) / (n_out - 1)
    lo = np.clip(np.floor(src).astype(np.int64), 0, n_in - 2)
    frac = src - lo
    u = np.zeros((n_out, n_in), dtype=np.float64)
    u[np.arange(n_out), lo] += 1.0 - frac
    u[np.arange(n_out), lo + 1] += frac
    return u


def _tap_masks(batch, oh, ow):
    """(9, 1, batch*oh*ow) 0/1 validity masks for the 9 taps (3x3 SAME zero padding)."""
    yy = np.arange(oh)[:, None]
    xx = np.arange(ow)[None, :]
    ms = []
    for dy, dx in _TAPS:
        m = ((yy + dy >= 0) & (yy + dy < oh) & (xx + dx >= 0) & (xx + dx < ow))
        ms.append(np.tile(m.reshape(-1).astype(np.float32), batch))
    return np.stack(ms)[:, None, :]


def init_params(key, nc1, nc2, imsize):
    ks = jax.random.split(key, 4)
    scale = 0.2
    return {
        'w1': (jax.random.normal(ks[0], (9, nc1, nc1)) * scale).astype(jnp.float32),
        'w2': (jax.random.normal(ks[1], (9, nc1, nc2)) * scale).astype(jnp.float32),
        'ws': (jax.random.normal(ks[2], (9, nc1, nc2)) * scale).astype(jnp.float32),
        'g1': jnp.ones((nc1,), jnp.float32), 'b1': jnp.zeros((nc1,), jnp.float32),
        'g2': jnp.ones((nc2,), jnp.float32), 'b2': jnp.zeros((nc2,), jnp.float32),
        'gs': jnp.ones((nc2,), jnp.float32), 'bs': jnp.zeros((nc2,), jnp.float32),
        'noise_const': jax.random.normal(ks[3], (imsize, imsize), jnp.float32),
        # torch init is zeros([]); use a nonzero value so the noise path is exercised.
        'strength': jnp.full((1, 1), 0.1, jnp.float32),
    }


def make_noise(params, noise_mode, batch, imsize, key=None):
    if noise_mode == 'random':
        return jax.random.normal(key, (batch, 1, imsize, imsize), jnp.float32)
    if noise_mode == 'const':
        return jnp.broadcast_to(params['noise_const'][None, None],
                                (batch, 1, imsize, imsize))
    return jnp.zeros((batch, 1, imsize, imsize), jnp.float32)


def noise_res_up_conv_block(x_nchw, params, noise_nchw):
    b, c1, h, w = x_nchw.shape
    oh, ow = 2 * h, 2 * w
    bp = b * oh * ow
    c2 = params['w2'].shape[2]

    # --- bilinear x2 upsample (align_corners=True): separable, two tiny einsums (XLA) ---
    uh = jnp.asarray(_upsample_matrix(h, oh), jnp.float32)           # (OH, H)
    uw = jnp.asarray(_upsample_matrix(w, ow), jnp.float32)           # (OW, W)
    xf = x_nchw.astype(jnp.float32)
    up = jnp.einsum('uh,bchw->bcuw', uh, xf, precision=lax.Precision.HIGHEST)
    up = jnp.einsum('vw,bchw->bchv', uw, up, precision=lax.Precision.HIGHEST)  # (B,C1,OH,OW)

    # --- lane-dense kernel layout: channels on sublanes, flattened (b, oh, ow) on lanes ---
    up_flat = jnp.transpose(up, (1, 0, 2, 3)).reshape(c1, bp)
    noise_flat = jnp.transpose(noise_nchw.astype(jnp.float32), (1, 0, 2, 3)).reshape(1, bp)
    masks = jnp.asarray(_tap_masks(b, oh, ow), jnp.float32)          # (9, 1, BP)

    def fuse(w9):  # (9, cin, cout) -> (cout, 9*cin) bf16 for the tap-fused MXU matmul
        co, ci = w9.shape[2], w9.shape[1]
        return jnp.transpose(w9, (2, 0, 1)).reshape(co, 9 * ci).astype(jnp.bfloat16)

    w1f, w2f, wsf = fuse(params['w1']), fuse(params['w2']), fuse(params['ws'])
    g1, b1 = params['g1'].reshape(c1, 1), params['b1'].reshape(c1, 1)
    g2, b2 = params['g2'].reshape(c2, 1), params['b2'].reshape(c2, 1)
    gs, bs = params['gs'].reshape(c2, 1), params['bs'].reshape(c2, 1)

    kernel = _make_kernel(ow, bp, _roll_sign())

    vm = pl.BlockSpec(memory_space=pltpu.MemorySpace.VMEM)
    sm = pl.BlockSpec(memory_space=pltpu.MemorySpace.SMEM)

    flops = 2 * bp * (9 * c1) * (c1 + 2 * c2)             # three tap-fused convolutions
    transcendentals = 2 * bp * (c1 + c2)                  # exp + reciprocal in the two mish
    bytes_accessed = int(
        4 * (up_flat.size + masks.size + noise_flat.size + 2 * (c1 + 2 * c2) + 1)
        + 2 * (w1f.size + w2f.size + wsf.size)
        + 4 * c2 * bp)

    out_flat = pl.pallas_call(
        kernel,
        out_shape=jax.ShapeDtypeStruct((c2, bp), jnp.float32),
        in_specs=[vm] * 12 + [sm],
        out_specs=vm,
        compiler_params=pltpu.CompilerParams(vmem_limit_bytes=32 * 1024 * 1024),
        cost_estimate=pl.CostEstimate(flops=flops, transcendentals=transcendentals,
                                      bytes_accessed=bytes_accessed),
    )(up_flat, masks, w1f, w2f, wsf, g1, b1, g2, b2, gs, bs, noise_flat,
      params['strength'])

    return out_flat.reshape(c2, b, oh, ow).transpose(1, 0, 2, 3)


# ----------------------------- pure-JAX reference (for verification) -----------------------------
def reference_forward(x_nchw, params, noise_nchw):
    b, c1, h, w = x_nchw.shape
    oh, ow = 2 * h, 2 * w
    uh = jnp.asarray(_upsample_matrix(h, oh), jnp.float32)
    uw = jnp.asarray(_upsample_matrix(w, ow), jnp.float32)
    x = jnp.transpose(x_nchw, (0, 2, 3, 1)).astype(jnp.float32)      # NHWC
    up = jnp.einsum('ai,bijc->bajc', uh, x, precision=lax.Precision.HIGHEST)
    up = jnp.einsum('dj,bajc->badc', uw, up, precision=lax.Precision.HIGHEST)

    def conv(z, w9):
        wk = w9.reshape(3, 3, w9.shape[1], w9.shape[2])
        return lax.conv_general_dilated(z, wk, (1, 1), 'SAME',
                                        dimension_numbers=('NHWC', 'HWIO', 'NHWC'),
                                        precision=lax.Precision.HIGHEST)

    def bn(hh, g, bb):
        return _bn_train(hh, g.reshape(1, 1, 1, -1), bb.reshape(1, 1, 1, -1), axes=(0, 1, 2))

    a1 = _mish_ref(bn(conv(up, params['w1']), params['g1'], params['b1']))
    xm = _mish_ref(bn(conv(a1, params['w2']), params['g2'], params['b2']))
    xm = xm + jnp.transpose(noise_nchw, (0, 2, 3, 1)) * params['strength'][0, 0]
    xs = bn(conv(up, params['ws']), params['gs'], params['bs'])
    return jnp.transpose(xm + xs, (0, 3, 1, 2))


if __name__ == "__main__":
    B, NC1, NC2, H = 2, 4, 8, 8
    IMSIZE = 2 * H  # module invariant: imsize == 2 * input spatial size

    key = jax.random.PRNGKey(0)
    k_x, k_p, k_n = jax.random.split(key, 3)
    x = jax.random.normal(k_x, (B, NC1, H, H), jnp.float32)           # NCHW input, as in torch
    params = init_params(k_p, NC1, NC2, IMSIZE)
    noise = make_noise(params, 'random', B, IMSIZE, key=k_n)          # forward default noise_mode

    out = jax.block_until_ready(noise_res_up_conv_block(x, params, noise))
    assert out.shape == (B, NC2, IMSIZE, IMSIZE), out.shape

    ref = jax.block_until_ready(reference_forward(x, params, noise))
    # Kernel uses bf16 MXU operands (per perf review); reference is f32 Precision.HIGHEST.
    diff = jnp.abs(out - ref)
    bound = 1e-1 + 5e-2 * jnp.abs(ref)
    if bool(jnp.any(diff > bound)):
        raise AssertionError(
            f"mismatch vs reference: max abs err {float(jnp.max(diff)):.3e}")
    print("KERNEL_OK")
</pallas_src>

<mosaic_0001>
module attributes {stable_mosaic.version = 11 : i64} {
  func.func @k(%arg0: memref<8x128xf32, #tpu.memory_space<vmem>>, %arg1: memref<8x128xf32, #tpu.memory_space<vmem>>) attributes {dimension_semantics = [], scalar_prefetch = 0 : i64, scratch_operands = 0 : i64, tpu.core_type = #tpu.core_type<tc>} {
    %c0 = arith.constant 0 : index
    %c0_0 = arith.constant 0 : index
    %0 = vector.load %arg0[%c0, %c0_0] : memref<8x128xf32, #tpu.memory_space<vmem>>, vector<8x128xf32>
    %c1_i32 = arith.constant 1 : i32
    %1 = tpu.dynamic_rotate %0 by %c1_i32 dim 1 : vector<8x128xf32>, i32 -> vector<8x128xf32>
    %c0_1 = arith.constant 0 : index
    %c0_2 = arith.constant 0 : index
    %2 = vector.load %arg1[%c0_1, %c0_2] : memref<8x128xf32, #tpu.memory_space<vmem>>, vector<8x128xf32>
    tpu.vector_store %arg1[%c0_1, %c0_2], %1 {strides = array<i32>} : memref<8x128xf32, #tpu.memory_space<vmem>>, vector<8x128xf32>,
    return
  }
}

</mosaic_0001>

<bundles_post_ra>
// kernel: tpu_custom_call.1
= control target key start
LH: loop header
LB: loop body
LE: loop exit
PB: predicated region body
PF: predicated region fallthrough
CT: control target
= control target key end

     0   :  { %6 = vsyncpa [#allocation3], 0  ;;  %s106_s0 = inlined_call_operand.hbm [shape: f32[8,128], index: 0, kind: input, shape index: {}]   ;;  %s107_s1 = inlined_call_operand.hbm [shape: f32[8,128], index: 1, kind: output, shape index: {}]  }
   0x1   :  { %7 = vsyncpa [#allocation4], 0  ;;  %s87_s6 = smov [#allocation2]  }
   0x2   :  { %s14_s7 = sshll.u32 %s87_s6, 4  ;;  %s15_s7 = int_to_ptr.vmem [resolvable:$true] %s14_s7 }
   0x3   :  { %s51_s8 = scalar_lea.vmem %s15_s7, 128  ;;  %p56_p1 = scmp.lt.s32.totalorder %s15_s7, %s15_s7 }
   0x4   :  { %p52_p0 = scmp.ne.s32.totalorder %s15_s7, %s51_s8  ;;  %p57_p2 = scmp.lt.s32.totalorder %s51_s8, %s51_s8 }
   0x6   :  { %p58_p3 = por %p57_p2, %p56_p1 }
   0x8   :  { %p59_p4 = pnand %p58_p3, %p52_p0 }
   0xa   :  { %62 = shalt.err (!%p59_p4)
}
   0xb   :  { %17 = dma.hbm_to_vmem [thread:$0]  %s106_s0, 128, %s15_s7, [#allocation3]  }
   0xc   :  { %83 = dma.done.wait [#allocation3], 128  }
   0xd   :  { %84 = vsyncadd [#allocation3], 4294967168  ;;  %v21_v0 = vld [vmem:[#allocation2] sm:$0xff]  ;;  %s88_s11 = smov 1   ;;  %s89_s12 = smov [#allocation5]  }
   0xe   :  { %22 = vrot.lane.b32.xlu0 %v21_v0, %s88_s11  ;;  %s31_s13 = sshll.u32 %s89_s12, 4  ;;  %s32_s13 = int_to_ptr.vmem [resolvable:$true] %s31_s13 }
   0xf   :  { %s63_s14 = scalar_lea.vmem %s32_s13, 128  ;;  %p68_p6 = scmp.lt.s32.totalorder %s32_s13, %s32_s13 }
  0x10   :  { %p64_p5 = scmp.ne.s32.totalorder %s32_s13, %s63_s14  ;;  %p69_p7 = scmp.lt.s32.totalorder %s63_s14, %s63_s14 }
  0x12   :  { %p70_p8 = por %p69_p7, %p68_p6 }
  0x14   :  { %p71_p9 = pnand %p70_p8, %p64_p5 }
  0x80   :  { %v23_v1 = vpop.permute.xlu0 %22 }
  0x81   :  { %24 = vst [vmem:[#allocation5] sm:$0xff] %v23_v1 }
  0x82   :  { %74 = shalt.err (!%p71_p9)
}
  0x83   :  { %34 = dma.vmem_to_hbm [thread:$0]  %s32_s13, 128, %s107_s1, [#allocation4]  }
  0x84   :  { %85 = dma.done.wait [#allocation4], 128  }
  0x85   :  { %86 = vsyncadd [#allocation4], 4294967168 }
  0x86   :  { %38 = vsyncpa [#allocation3], 1 }
  0x87   :  { %39 = vsyncpa [#allocation4], 1 }

</bundles_post_ra>
